<compile_context>
chip_gen: v6e
topology: v6e:2x2x1
jax: 0.10.0
libtpu: 0.0.40
codegen_flags: <defaults>
</compile_context>

<pallas_src>
import functools

import jax
import jax.numpy as jnp
from jax import lax
from jax.experimental import pallas as pl
from jax.experimental.pallas import tpu as pltpu

_LANE = 128
_SUBLANE = 8
_NEG_BIG = -1e30
_PAD_BIG = 1e30


def _round_up(x, m):
    return ((x + m - 1) // m) * m


# ---------------------------------------------------------------------------
# Kernels
# ---------------------------------------------------------------------------
def _mlp_features(x_ref, w1_ref, b1_ref, w2_ref, b2_ref):
    """Linear -> ReLU -> (Dropout=identity) -> Linear; bf16 MXU, f32 accumulate."""
    # TODO(synk): nn.Dropout(p=0.3) is stochastic in train mode; eval-mode identity here.
    h = jnp.dot(x_ref[...], w1_ref[...], preferred_element_type=jnp.float32)
    h = jnp.maximum(h + b1_ref[...].astype(jnp.float32), 0.0)
    feat = jnp.dot(h.astype(jnp.bfloat16), w2_ref[...],
                   preferred_element_type=jnp.float32)
    return feat + b2_ref[...].astype(jnp.float32)


def pg_softmax_kernel(x_ref, w1_ref, b1_ref, w2_ref, b2_ref, wout_ref, out_ref,
                      *, n_actions):
    feat = _mlp_features(x_ref, w1_ref, b1_ref, w2_ref, b2_ref)        # [TB, HP] f32
    logits = jnp.dot(feat.astype(jnp.bfloat16), wout_ref[...],
                     preferred_element_type=jnp.float32)                # [TB, AP] f32
    tb, ap = out_ref.shape
    lane = lax.broadcasted_iota(jnp.int32, (tb, ap), 1)
    valid = lane < n_actions
    logits = jnp.where(valid, logits, _NEG_BIG)
    m = jnp.max(logits, axis=-1, keepdims=True)
    e = jnp.where(valid, jnp.exp(logits - m), 0.0)
    probs = e * pl.reciprocal(jnp.sum(e, axis=-1, keepdims=True), approx=True)
    out_ref[...] = probs.astype(out_ref.dtype)                          # lane-dense store


def pg_harmonic_kernel(x_ref, w1_ref, b1_ref, w2_ref, b2_ref, wharm_ref, out_ref,
                       *, n_actions, harmonic_exponent, distance_norm):
    feat = _mlp_features(x_ref, w1_ref, b1_ref, w2_ref, b2_ref)        # [TB, HP] f32
    w = wharm_ref[...].astype(jnp.float32)                              # [A,  HP] f32
    tb, ap = out_ref.shape
    lane = lax.broadcasted_iota(jnp.int32, (tb, ap), 1)
    valid = lane < n_actions
    use_l1 = distance_norm.upper() == "L1"
    p = int(harmonic_exponent)   # keep integer -> integer_pow (repeated multiplies)

    # Per-action distances with lane-dense [TB, HP] intermediates: exact (no
    # cancellation from the ||f||^2+||w||^2-2fw expansion) and no [TB, A, H]
    # broadcast. n_actions is tiny for discrete-control envs; a single MXU
    # expansion would only pay off for very large action counts.
    metric = jnp.full((tb, ap), _PAD_BIG, jnp.float32)   # L1: dist, L2: dist^2
    for a in range(n_actions):
        diff = feat - w[a:a + 1, :]
        if use_l1:
            d = jnp.sum(jnp.abs(diff), axis=-1, keepdims=True)
        else:
            d = jnp.sum(diff * diff, axis=-1, keepdims=True)
        metric = jnp.where(lane == a, d, metric)

    # TODO(synk): torch branch prints a host-side warning when min_dist < 1e-6; skipped.
    if (not use_l1) and (p % 2 == 0):
        # sqrt-free for even exponents: (dist/min)^p == (dist_sq/min_sq)^(p/2)
        dist_sq = metric + 1e-8
        min_sq = jnp.maximum(jnp.min(dist_sq, axis=-1, keepdims=True), 1e-12)
        ratio = dist_sq * pl.reciprocal(min_sq, approx=True)
        dist_exp = ratio ** (p // 2)
    else:
        dist = metric if use_l1 else jnp.sqrt(metric + 1e-8)
        min_d = jnp.maximum(jnp.min(dist, axis=-1, keepdims=True), 1e-6)
        dist_exp = (dist * pl.reciprocal(min_d, approx=True)) ** p
    dist_exp = jnp.where(valid, dist_exp, 1.0)            # keep padded lanes finite
    inv = pl.reciprocal(dist_exp + 1e-8, approx=True)
    inv = jnp.where(valid, inv, 0.0)
    probs = inv * pl.reciprocal(jnp.sum(inv, axis=-1, keepdims=True), approx=True)
    out_ref[...] = probs.astype(out_ref.dtype)


# ---------------------------------------------------------------------------
# Wrappers
# ---------------------------------------------------------------------------
def _pick_block_b(batch, obs_dim, hp, ap):
    """Rows per grid step: big enough to amortize the ~0.35us/step overhead, small
    enough to double-buffer comfortably within v7x's 64 MiB VMEM and to keep >= 2
    grid steps (pipelining + megacore) for realistic rollout batches."""
    try:
        vmem_bytes = pltpu.get_tpu_info().vmem_capacity_bytes
    except Exception:
        vmem_bytes = 64 * 1024 * 1024
    # double-buffered bf16 x tile + f32 out tile, plus ~4 f32 [TB, HP] temporaries
    per_row = 2 * (2 * obs_dim + 4 * ap) + 4 * 4 * hp
    cap = max(_SUBLANE, min(256, (vmem_bytes // 8) // max(per_row, 1)))
    tb = min(cap, _round_up(batch, _SUBLANE))
    return max(_SUBLANE, (tb // _SUBLANE) * _SUBLANE)


def _pad2(a, rows, cols, dtype):
    r, c = a.shape
    return jnp.pad(a, ((0, rows - r), (0, cols - c))).astype(dtype)


def _pallas_forward(kernel, x, w1, b1, w2, b2, head, head_shape, n_actions,
                    block_b=None):
    B, obs_dim = x.shape
    hidden = w1.shape[1]
    hp = _round_up(hidden, _LANE)          # lane-dense hidden (zero padding is exact)
    ap = _round_up(n_actions, _LANE)       # lane-dense output / head N
    tb = block_b if block_b is not None else _pick_block_b(B, obs_dim, hp, ap)
    tb = _round_up(tb, _SUBLANE)
    bp = _round_up(B, tb)

    x_p = _pad2(x, bp, obs_dim, jnp.bfloat16)
    w1_p = _pad2(w1, obs_dim, hp, jnp.bfloat16)
    b1_p = _pad2(b1, 1, hp, jnp.float32)
    w2_p = _pad2(w2, hp, hp, jnp.bfloat16)
    b2_p = _pad2(b2, 1, hp, jnp.float32)
    head_p = _pad2(head, head_shape[0], head_shape[1], jnp.bfloat16)

    grid = (bp // tb,)
    in_specs = [
        pl.BlockSpec((tb, obs_dim), lambda i: (i, 0)),       # x (batch-tiled)
        pl.BlockSpec((obs_dim, hp), lambda i: (0, 0)),       # W1
        pl.BlockSpec((1, hp), lambda i: (0, 0)),             # b1
        pl.BlockSpec((hp, hp), lambda i: (0, 0)),            # W2
        pl.BlockSpec((1, hp), lambda i: (0, 0)),             # b2
        pl.BlockSpec(head_shape, lambda i: (0, 0)),          # head weights
    ]
    out_specs = pl.BlockSpec((tb, ap), lambda i: (i, 0))     # lane-dense output

    out = pl.pallas_call(
        kernel,
        out_shape=jax.ShapeDtypeStruct((bp, ap), jnp.float32),
        grid_spec=pltpu.PrefetchScalarGridSpec(
            num_scalar_prefetch=0, grid=grid,
            in_specs=in_specs, out_specs=out_specs),
        compiler_params=pltpu.CompilerParams(
            dimension_semantics=("parallel",)),   # megacore sharding on v7x
    )(x_p, w1_p, b1_p, w2_p, b2_p, head_p)
    return out[:B, :n_actions]


def pg_forward_softmax(x, w1, b1, w2, b2, wout, block_b=None):
    hidden = w1.shape[1]
    n_actions = wout.shape[1]
    hp = _round_up(hidden, _LANE)
    ap = _round_up(n_actions, _LANE)
    kernel = functools.partial(pg_softmax_kernel, n_actions=n_actions)
    return _pallas_forward(kernel, x, w1, b1, w2, b2, wout, (hp, ap),
                           n_actions, block_b)


def pg_forward_harmonic(x, w1, b1, w2, b2, wharm, harmonic_exponent=4,
                        distance_norm="L2", block_b=None):
    hidden = w1.shape[1]
    n_actions = wharm.shape[0]
    hp = _round_up(hidden, _LANE)
    kernel = functools.partial(pg_harmonic_kernel, n_actions=n_actions,
                               harmonic_exponent=harmonic_exponent,
                               distance_norm=distance_norm)
    return _pallas_forward(kernel, x, w1, b1, w2, b2, wharm, (n_actions, hp),
                           n_actions, block_b)


# ---------------------------------------------------------------------------
# Pure-JAX references (mirror the kernel's bf16 operand rounding)
# ---------------------------------------------------------------------------
def _bf16(a):
    return a.astype(jnp.bfloat16).astype(jnp.float32)


def _ref_features(x, w1, b1, w2, b2):
    h = jnp.maximum(_bf16(x) @ _bf16(w1) + b1, 0.0)
    return _bf16(h) @ _bf16(w2) + b2


def ref_softmax(x, w1, b1, w2, b2, wout):
    feat = _ref_features(x, w1, b1, w2, b2)
    logits = _bf16(feat) @ _bf16(wout)
    return jax.nn.softmax(logits, axis=1)


def ref_harmonic(x, w1, b1, w2, b2, wharm, harmonic_exponent=4, distance_norm="L2"):
    feat = _ref_features(x, w1, b1, w2, b2)
    diff = feat[:, None, :] - _bf16(wharm)[None, :, :]
    if distance_norm.upper() == "L1":
        dist = jnp.sum(jnp.abs(diff), axis=-1)
    else:
        dist = jnp.sqrt(jnp.sum(diff ** 2, axis=-1) + 1e-8)
    dist = dist / jnp.maximum(jnp.min(dist, axis=-1, keepdims=True), 1e-6)
    inv = 1.0 / (dist ** int(harmonic_exponent) + 1e-8)
    return inv / jnp.sum(inv, axis=1, keepdims=True)


# ---------------------------------------------------------------------------
# Main
# ---------------------------------------------------------------------------
if __name__ == "__main__":
    # CartPole-like feature sizes (obs_dim=4, hidden=16, n_actions=2) and a
    # rollout-sized batch so the grid has multiple steps (TB=256 -> grid=(4,)).
    B, obs_dim, hidden, n_actions = 1024, 4, 16, 2

    key = jax.random.PRNGKey(0)
    kx, k1, kb1, k2, kb2, kout, kharm = jax.random.split(key, 7)
    x = jax.random.normal(kx, (B, obs_dim), dtype=jnp.float32)
    w1 = jax.random.normal(k1, (obs_dim, hidden), dtype=jnp.float32) * 0.5
    b1 = jax.random.normal(kb1, (1, hidden), dtype=jnp.float32) * 0.1
    w2 = jax.random.normal(k2, (hidden, hidden), dtype=jnp.float32) * 0.25
    b2 = jax.random.normal(kb2, (1, hidden), dtype=jnp.float32) * 0.1
    wout = jax.random.normal(kout, (hidden, n_actions), dtype=jnp.float32) * 0.5
    wharm = jax.random.normal(kharm, (n_actions, hidden), dtype=jnp.float32)

    # layer_type='softmax' (module default)
    probs_sm = pg_forward_softmax(x, w1, b1, w2, b2, wout)
    jax.block_until_ready(probs_sm)
    assert probs_sm.shape == (B, n_actions)
    r_sm = ref_softmax(x, w1, b1, w2, b2, wout)
    assert jnp.allclose(probs_sm, r_sm, atol=2e-2, rtol=2e-2), "softmax head mismatch"
    assert jnp.allclose(jnp.sum(probs_sm, axis=1), 1.0, atol=1e-2)

    # layer_type='harmonic', distance_norm='L2' (default), harmonic_exponent=4
    probs_l2 = pg_forward_harmonic(x, w1, b1, w2, b2, wharm)
    jax.block_until_ready(probs_l2)
    r_l2 = ref_harmonic(x, w1, b1, w2, b2, wharm)
    assert jnp.allclose(probs_l2, r_l2, atol=2e-2, rtol=2e-2), "harmonic-L2 mismatch"
    assert jnp.allclose(jnp.sum(probs_l2, axis=1), 1.0, atol=1e-2)

    # layer_type='harmonic', distance_norm='L1'
    probs_l1 = pg_forward_harmonic(x, w1, b1, w2, b2, wharm, distance_norm="L1")
    jax.block_until_ready(probs_l1)
    r_l1 = ref_harmonic(x, w1, b1, w2, b2, wharm, distance_norm="L1")
    assert jnp.allclose(probs_l1, r_l1, atol=2e-2, rtol=2e-2), "harmonic-L1 mismatch"
    assert jnp.allclose(jnp.sum(probs_l1, axis=1), 1.0, atol=1e-2)

    print("KERNEL_OK")
</pallas_src>

<mosaic_0001>
module attributes {stable_mosaic.version = 11 : i64} {
  func.func @pg_softmax_kernel(%arg0: i32, %arg1: memref<256x4xbf16, #tpu.memory_space<vmem>>, %arg2: memref<4x128xbf16, #tpu.memory_space<vmem>>, %arg3: memref<1x128xf32, #tpu.memory_space<vmem>>, %arg4: memref<128x128xbf16, #tpu.memory_space<vmem>>, %arg5: memref<1x128xf32, #tpu.memory_space<vmem>>, %arg6: memref<128x128xbf16, #tpu.memory_space<vmem>>, %arg7: memref<256x128xf32, #tpu.memory_space<vmem>>) attributes {dimension_semantics = [#tpu.dimension_semantics<parallel>], iteration_bounds = array<i64: 4>, scalar_prefetch = 0 : i64, scratch_operands = 0 : i64, tpu.core_type = #tpu.core_type<tc>, window_params = [{transform_indices = @transform_0, window_bounds = array<i64: 256, 4>}, {pipeline_mode = #tpu.pipeline_mode<synchronous>, transform_indices = @transform_1, window_bounds = array<i64: 4, 128>}, {pipeline_mode = #tpu.pipeline_mode<synchronous>, transform_indices = @transform_2, window_bounds = array<i64: 1, 128>}, {pipeline_mode = #tpu.pipeline_mode<synchronous>, transform_indices = @transform_3, window_bounds = array<i64: 128, 128>}, {pipeline_mode = #tpu.pipeline_mode<synchronous>, transform_indices = @transform_4, window_bounds = array<i64: 1, 128>}, {pipeline_mode = #tpu.pipeline_mode<synchronous>, transform_indices = @transform_5, window_bounds = array<i64: 128, 128>}, {transform_indices = @transform_6, window_bounds = array<i64: 256, 128>}]} {
    %c0 = arith.constant 0 : index
    %c0_0 = arith.constant 0 : index
    %0 = vector.load %arg1[%c0, %c0_0] : memref<256x4xbf16, #tpu.memory_space<vmem>>, vector<256x4xbf16>
    %c0_1 = arith.constant 0 : index
    %c0_2 = arith.constant 0 : index
    %1 = vector.load %arg2[%c0_1, %c0_2] : memref<4x128xbf16, #tpu.memory_space<vmem>>, vector<4x128xbf16>
    %cst = arith.constant dense<0.000000e+00> : vector<256x128xf32>
    %2 = tpu.matmul %0, %1, %cst {dimension_numbers = #tpu.dot_dimension_numbers<[1], [0], [0], [1], [0, 0, 1, 1], [], []>} : vector<256x4xbf16>, vector<4x128xbf16>, vector<256x128xf32> -> vector<256x128xf32>
    %c0_3 = arith.constant 0 : index
    %c0_4 = arith.constant 0 : index
    %3 = vector.load %arg3[%c0_3, %c0_4] : memref<1x128xf32, #tpu.memory_space<vmem>>, vector<1x128xf32>
    %4 = vector.broadcast %3 : vector<1x128xf32> to vector<256x128xf32>
    %5 = arith.addf %2, %4 : vector<256x128xf32>
    %cst_5 = arith.constant 0.000000e+00 : f32
    %6 = vector.broadcast %cst_5 : f32 to vector<256x128xf32>
    %7 = arith.maximumf %5, %6 : vector<256x128xf32>
    %8 = arith.truncf %7 : vector<256x128xf32> to vector<256x128xbf16>
    %c0_6 = arith.constant 0 : index
    %c0_7 = arith.constant 0 : index
    %9 = vector.load %arg4[%c0_6, %c0_7] : memref<128x128xbf16, #tpu.memory_space<vmem>>, vector<128x128xbf16>
    %cst_8 = arith.constant dense<0.000000e+00> : vector<256x128xf32>
    %10 = tpu.matmul %8, %9, %cst_8 {dimension_numbers = #tpu.dot_dimension_numbers<[1], [0], [0], [1], [0, 0, 1, 1], [], []>} : vector<256x128xbf16>, vector<128x128xbf16>, vector<256x128xf32> -> vector<256x128xf32>
    %c0_9 = arith.constant 0 : index
    %c0_10 = arith.constant 0 : index
    %11 = vector.load %arg5[%c0_9, %c0_10] : memref<1x128xf32, #tpu.memory_space<vmem>>, vector<1x128xf32>
    %12 = vector.broadcast %11 : vector<1x128xf32> to vector<256x128xf32>
    %13 = arith.addf %10, %12 : vector<256x128xf32>
    %14 = arith.truncf %13 : vector<256x128xf32> to vector<256x128xbf16>
    %c0_11 = arith.constant 0 : index
    %c0_12 = arith.constant 0 : index
    %15 = vector.load %arg6[%c0_11, %c0_12] : memref<128x128xbf16, #tpu.memory_space<vmem>>, vector<128x128xbf16>
    %cst_13 = arith.constant dense<0.000000e+00> : vector<256x128xf32>
    %16 = tpu.matmul %14, %15, %cst_13 {dimension_numbers = #tpu.dot_dimension_numbers<[1], [0], [0], [1], [0, 0, 1, 1], [], []>} : vector<256x128xbf16>, vector<128x128xbf16>, vector<256x128xf32> -> vector<256x128xf32>
    %17 = tpu.iota {dimensions = array<i32: 1>} : vector<256x128xi32>
    %c2_i32 = arith.constant 2 : i32
    %18 = vector.broadcast %c2_i32 : i32 to vector<256x128xi32>
    %19 = arith.cmpi slt, %17, %18 : vector<256x128xi32>
    %cst_14 = arith.constant -1.000000e+30 : f32
    %20 = vector.broadcast %cst_14 : f32 to vector<256x128xf32>
    %21 = arith.select %19, %16, %20 : vector<256x128xi1>, vector<256x128xf32>
    %cst_15 = arith.constant dense<0xFF800000> : vector<256xf32>
    %22 = vector.multi_reduction <maximumf>, %21, %cst_15 [1] : vector<256x128xf32> to vector<256xf32>
    %23 = vector.shape_cast %22 : vector<256xf32> to vector<256x1xf32>
    %24 = vector.broadcast %23 : vector<256x1xf32> to vector<256x128xf32>
    %25 = arith.subf %21, %24 : vector<256x128xf32>
    %26 = math.exp %25 : vector<256x128xf32>
    %cst_16 = arith.constant 0.000000e+00 : f32
    %27 = vector.broadcast %cst_16 : f32 to vector<256x128xf32>
    %28 = arith.select %19, %26, %27 : vector<256x128xi1>, vector<256x128xf32>
    %cst_17 = arith.constant dense<0.000000e+00> : vector<256xf32>
    %29 = vector.multi_reduction <add>, %28, %cst_17 [1] : vector<256x128xf32> to vector<256xf32>
    %30 = vector.shape_cast %29 : vector<256xf32> to vector<256x1xf32>
    %31 = tpu.reciprocal %30 {approx = true} : vector<256x1xf32> -> vector<256x1xf32>
    %32 = vector.broadcast %31 : vector<256x1xf32> to vector<256x128xf32>
    %33 = arith.mulf %28, %32 : vector<256x128xf32>
    %c0_18 = arith.constant 0 : index
    %c0_19 = arith.constant 0 : index
    %34 = vector.load %arg7[%c0_18, %c0_19] : memref<256x128xf32, #tpu.memory_space<vmem>>, vector<256x128xf32>
    tpu.vector_store %arg7[%c0_18, %c0_19], %33 {strides = array<i32>} : memref<256x128xf32, #tpu.memory_space<vmem>>, vector<256x128xf32>,
    return
  }
  func.func @transform_0(%arg0: i32) -> (i32, i32) {
    %c0_i32 = arith.constant 0 : i32
    %c0_i32_0 = arith.constant 0 : i32
    return %arg0, %c0_i32 : i32, i32
  }
  func.func @transform_1(%arg0: i32) -> (i32, i32) {
    %c0_i32 = arith.constant 0 : i32
    %c0_i32_0 = arith.constant 0 : i32
    %c0_i32_1 = arith.constant 0 : i32
    return %c0_i32, %c0_i32_0 : i32, i32
  }
  func.func @transform_2(%arg0: i32) -> (i32, i32) {
    %c0_i32 = arith.constant 0 : i32
    %c0_i32_0 = arith.constant 0 : i32
    %c0_i32_1 = arith.constant 0 : i32
    return %c0_i32, %c0_i32_0 : i32, i32
  }
  func.func @transform_3(%arg0: i32) -> (i32, i32) {
    %c0_i32 = arith.constant 0 : i32
    %c0_i32_0 = arith.constant 0 : i32
    %c0_i32_1 = arith.constant 0 : i32
    return %c0_i32, %c0_i32_0 : i32, i32
  }
  func.func @transform_4(%arg0: i32) -> (i32, i32) {
    %c0_i32 = arith.constant 0 : i32
    %c0_i32_0 = arith.constant 0 : i32
    %c0_i32_1 = arith.constant 0 : i32
    return %c0_i32, %c0_i32_0 : i32, i32
  }
  func.func @transform_5(%arg0: i32) -> (i32, i32) {
    %c0_i32 = arith.constant 0 : i32
    %c0_i32_0 = arith.constant 0 : i32
    %c0_i32_1 = arith.constant 0 : i32
    return %c0_i32, %c0_i32_0 : i32, i32
  }
  func.func @transform_6(%arg0: i32) -> (i32, i32) {
    %c0_i32 = arith.constant 0 : i32
    %c0_i32_0 = arith.constant 0 : i32
    return %arg0, %c0_i32 : i32, i32
  }
}

</mosaic_0001>

<bundles_post_ra>
// kernel: tpu_custom_call.1
= control target key start
LH: loop header
LB: loop body
LE: loop exit
PB: predicated region body
PF: predicated region fallthrough
CT: control target
= control target key end

     0   :  { %11 = vsyncpa [#allocation3], 0  ;;  %s2830_s0 = inlined_call_operand.vmem [shape: bf16[1024,4], index: 0, kind: input, shape index: {}]   ;;  %s2831_s1 = inlined_call_operand.vmem [shape: bf16[4,128], index: 1, kind: input, shape index: {}]   ;;  %s2832_s2 = inlined_call_operand.vmem [shape: f32[1,128], index: 2, kind: input, shape index: {}]   ;;  %s2833_s3 = inlined_call_operand.vmem [shape: bf16[128,128], index: 3, kind: input, shape index: {}]   ;;  %s2834_s4 = inlined_call_operand.vmem [shape: f32[1,128], index: 4, kind: input, shape index: {}]   ;;  %s2835_s5 = inlined_call_operand.vmem [shape: bf16[128,128], index: 5, kind: input, shape index: {}]   ;;  %s2836_s6 = inlined_call_operand.hbm [shape: f32[1024,128], index: 6, kind: output, shape index: {}]  }
   0x1   :  { %13 = vsyncpa [#allocation3 + $0x1], 0  ;;  %s2135_s21 = smov 0   ;;  %s2137_s22 = smov 0  }
   0x2   :  { %s2139_s23 = smov 0   ;;  %s2141_s24 = smov 0  }
   0x3 LB: > { %s2156_s25 = sadd.s32 4294967295, %s2095_s24   ;;  %s1572_s26 = sadd.s32 4294967294, %s2095_s24   ;;  %s2095_s24 = sphi %s2141_s24, %s2842_s24   ;;  %s2091_s23 = sphi %s2139_s23, %s2841_s23   ;;  %s2087_s22 = sphi %s2137_s22, %s2840_s22   ;;  %s2083_s21 = sphi %s2135_s21, %s2839_s21  }
   0x4   : > { %s2160_s27 = sadd.s32 1, %s2095_s24   ;;  %s157_s28 = sadd.s32 1, %s2091_s23 }
   0x5   : > { %s154_s29 = ssub.s32 %s2095_s24, %s2160_s27  ;;  %p167_p0 = scmp.ne.s32.totalorder %s2091_s23, %s2087_s22 }
   0x6   : > { %p155_p1 = scmp.eq.s32.totalorder %s154_s29, 0  ;;  %p168_p2 = scmp.eq.s32.totalorder %s2156_s25, 3 }
   0x7   : > { %p173_p3 = scmp.ne.s32.totalorder %s2087_s22, %s2083_s21  ;;  %p174_p4 = scmp.eq.s32.totalorder %s1572_s26, 3 }
   0x8   : > { %s2171_s30 = scalar_select %p155_p1, %s2091_s23, %s157_s28  }
   0x9   : > { %p2173_p5 = por %p168_p2, %p167_p0  ;;  %p2177_p6 = por %p174_p4, %p173_p3 }
   0xa   : > { %p1575_p7 = scmp.ge.s32.totalorder %s2095_s24, 1  ;;  %p216_p8 = scmp.lt.s32.totalorder %s2095_s24, 5 }
   0xc   : > { %p217_p9 = pnand %p1575_p7, %p216_p8 }
   0xd   : > { %s1577_s11 = sshll.u32 (!%p217_p9), %s2156_s25, 5  ;;  %s243_s28 = sand.u32 (!%p217_p9), 1, %s2087_s22  }
   0xe   : > { %220 = sbr.rel (%p217_p9) target bundleno = 1020 (0x3fc), region = 44  ;;  %p247_p10 = scmp.lt.s32.totalorder (!%p217_p9), %s1577_s11, 127 }
   0xf   : > { %s1576_s29 = sshll.u32 (!%p217_p9), %s243_s28, 8  ;;  %s1634_s10 = sshll.u32 (!%p217_p9), %s2156_s25, 12 }
  0x10   : > { %s2714_s9 = scalar_lea.vmem (!%p217_p9), [#allocation2], %s1576_s29  ;;  %s2790_s15 = scalar_lea.sflag (!%p217_p9), [#allocation3], %s243_s28 }
  0x11   : > { %s2097_s16 = smov (!%p217_p9), [#allocation2]  }
  0x13   : > { %v286_v0 = vld [vmem:[%s2831_s1] sm:$0x3]  ;;  %vm423_vm0 = vcmask 1041408   ;;  %v1891_v1 = vld [vmem:[%s2833_s3 + $0x38] sm:$0xff]   ;;  %s2844_s11 = smov (!%p247_p10, %s1577_s11), 127  ;;  %vm374_vm1 = vcmask 31744  }
  0x14   : > { %1832 = vmatprep.subr.msk.bf16.mxu0 %vm423_vm0, %v286_v0  ;;  %v425_v2 = vsel %vm423_vm0, %v286_v0, 0  ;;  %1833 = vmatprep.subr.msk.bf16.mxu1 %vm423_vm0, %v286_v0  ;;  %s1578_s14 = sshll.u32 %s2844_s11, 2  ;;  %v1892_v9 = vld [vmem:[%s2833_s3 + $0x30] sm:$0xff]   ;;  %v1893_v12 = vld [vmem:[%s2833_s3 + $0x28] sm:$0xff]   ;;  %v1894_v17 = vld [vmem:[%s2833_s3 + $0x20] sm:$0xff]   ;;  %s1510_s11 = sshll.u32 %s2714_s9, 4  ;;  %s2784_s11 = int_to_ptr.vmem [resolvable:$true] %s1510_s11 }
  0x15   : > { %1701 = vmatpush3.bf16.msra.mxu0 %v425_v2  ;;  %1831 = vmatpush3.bf16.msra.mxu1 %v425_v2  ;;  %s2193_s17 = scalar_lea.vmem %s2830_s0, %s1578_s14  ;;  %v1895_v18 = vld [vmem:[%s2833_s3 + $0x18] sm:$0xff]   ;;  %v1896_v23 = vld [vmem:[%s2833_s3 + $0x10] sm:$0xff]   ;;  %v1897_v24 = vld [vmem:[%s2833_s3 + $0x8] sm:$0xff]   ;;  %s2782_s14 = scalar_lea.hbm %s2836_s6, %s1634_s10 }
  0x16   : > { %1734 = vmatprep.subr.bf16.mxu1 %v1891_v1  ;;  %v1875_v3 = vld [vmem:[%s2193_s17] sm:$0xff]   ;;  %v1876_v4 = vld [vmem:[%s2193_s17 + $0x8] sm:$0xff]   ;;  %v1877_v5 = vld [vmem:[%s2193_s17 + $0x10] sm:$0xff]   ;;  %s2035_s25 = scalar_lea.vmem %s2784_s11, 4096 }
  0x17   : > { %1702 = vmatprep.mubr.msk.bf16.mxu0 %vm374_vm1, %v1875_v3  ;;  %v1878_v6 = vld [vmem:[%s2193_s17 + $0x18] sm:$0xff]   ;;  %v1879_v7 = vld [vmem:[%s2193_s17 + $0x20] sm:$0xff]   ;;  %v1884_v10 = vld [vmem:[%s2193_s17 + $0x48] sm:$0xff]   ;;  %p2036_p11 = scmp.ne.s32.totalorder %s2784_s11, %s2035_s25 }
  0x18   : > { %1703 = vmatmul.mubr.msk.bf16.vlgmr.msra.gmra.mxu0 %vm374_vm1, %v1876_v4  ;;  %v1883_v8 = vld [vmem:[%s2193_s17 + $0x40] sm:$0xff]   ;;  %v1885_v11 = vld [vmem:[%s2193_s17 + $0x50] sm:$0xff]   ;;  %v1880_v13 = vld [vmem:[%s2193_s17 + $0x28] sm:$0xff]  }
  0x19   : > { %1706 = vmatprep.mubr.msk.bf16.mxu0 %vm374_vm1, %v1877_v5  ;;  %1718 = vmatprep.mubr.msk.bf16.mxu1 %vm374_vm1, %v1883_v8  ;;  %v1881_v14 = vld [vmem:[%s2193_s17 + $0x30] sm:$0xff]   ;;  %v1886_v15 = vld [vmem:[%s2193_s17 + $0x58] sm:$0xff]   ;;  %v1887_v16 = vld [vmem:[%s2193_s17 + $0x60] sm:$0xff]   ;;  %p2037_p12 = pnand %p2036_p11, %p2173_p5 }
  0x1a   : > { %1719 = vmatmul.mubr.msk.bf16.vlgmr.msra.gmra.mxu1 %vm374_vm1, %v1884_v10  ;;  %v1882_v19 = vld [vmem:[%s2193_s17 + $0x38] sm:$0xff]   ;;  %v1888_v20 = vld [vmem:[%s2193_s17 + $0x68] sm:$0xff]   ;;  %v1889_v21 = vld [vmem:[%s2193_s17 + $0x70] sm:$0xff]  }
  0x1b   : > { %1722 = vmatprep.mubr.msk.bf16.mxu1 %vm374_vm1, %v1885_v11  ;;  %1735 = vmatpush3.bf16.msra.mxu1 %v1891_v1  ;;  %v1890_v22 = vld [vmem:[%s2193_s17 + $0x78] sm:$0xff]   ;;  %v1898_v25 = vld [vmem:[%s2833_s3] sm:$0xff]   ;;  %v1900_v27 = vld [vmem:[%s2835_s5 + $0x30] sm:$0xff]   ;;  %p2038_p13 = pneg %p2037_p12  ;;  %s2039_s17 = sshll.u32 %s2097_s16, 4  ;;  %s2040_s17 = int_to_ptr.vmem [resolvable:$false] %s2039_s17 }
  0x1c   : > { %1736 = vmatprep.subr.bf16.mxu1 %v1892_v9  ;;  %v1899_v26 = vld [vmem:[%s2835_s5 + $0x38] sm:$0xff]   ;;  %v1901_v28 = vld [vmem:[%s2835_s5 + $0x28] sm:$0xff]   ;;  %v1902_v29 = vld [vmem:[%s2835_s5 + $0x20] sm:$0xff]   ;;  %s2041_s18 = scalar_lea.vmem %s2040_s17, 8192  ;;  %p2042_p0 = scmp.lt.s32.totalorder %s2784_s11, %s2040_s17 }
  0x1d   : > { %1782 = vmatprep.subr.bf16.mxu0 %v1899_v26  ;;  %v1903_v30 = vld [vmem:[%s2835_s5 + $0x18] sm:$0xff]   ;;  %v1904_v31 = vld [vmem:[%s2835_s5 + $0x10] sm:$0xff]   ;;  %v2269_v34 = vld [vmem:[%s2832_s2] ss:$0 sm:$0xff]  ;;  %p2043_p1 = scmp.lt.s32.totalorder %s2041_s18, %s2035_s25 }
  0x1e   : > { %1783 = vmatpush3.bf16.msra.mxu0 %v1899_v26 }
  0x1f   : > { %1737 = vmatpush3.bf16.msra.mxu1 %v1892_v9  ;;  %1784 = vmatprep.subr.bf16.mxu0 %v1900_v27  ;;  %p2044_p2 = por %p2043_p1, %p2042_p0 }
  0x20   : > { %1707 = vmatmul.mubr.msk.bf16.gmra.mxu0 %vm374_vm1, %v1878_v6  ;;  %1738 = vmatprep.subr.bf16.mxu1 %v1893_v12 }
  0x21   : > { %1710 = vmatprep.mubr.msk.bf16.mxu0 %vm374_vm1, %v1879_v7  ;;  %p2045_p3 = pnand %p2044_p2, %p2038_p13 }
  0x22   : > { %1723 = vmatmul.mubr.msk.bf16.gmra.mxu1 %vm374_vm1, %v1886_v15  ;;  %1785 = vmatpush3.bf16.msra.mxu0 %v1900_v27 }
  0x23   : > { %1726 = vmatprep.mubr.msk.bf16.mxu1 %vm374_vm1, %v1887_v16  ;;  %1739 = vmatpush3.bf16.msra.mxu1 %v1893_v12 }
  0x24   : > { %1740 = vmatprep.subr.bf16.mxu1 %v1894_v17  ;;  %1786 = vmatprep.subr.bf16.mxu0 %v1901_v28 }
  0x26   : > { %1787 = vmatpush3.bf16.msra.mxu0 %v1901_v28 }
  0x27   : > { %1741 = vmatpush3.bf16.msra.mxu1 %v1894_v17  ;;  %1788 = vmatprep.subr.bf16.mxu0 %v1902_v29 }
  0x28   : > { %1711 = vmatmul.mubr.msk.bf16.gmra.mxu0 %vm374_vm1, %v1880_v13  ;;  %1742 = vmatprep.subr.bf16.mxu1 %v1895_v18 }
  0x29   : > { %1714 = vmatprep.mubr.msk.bf16.mxu0 %vm374_vm1, %v1881_v14 }
  0x2a   : > { %1727 = vmatmul.mubr.msk.bf16.gmra.mxu1 %vm374_vm1, %v1888_v20  ;;  %1789 = vmatpush3.bf16.msra.mxu0 %v1902_v29 }
  0x2b   : > { %1730 = vmatprep.mubr.msk.bf16.mxu1 %vm374_vm1, %v1889_v21  ;;  %1743 = vmatpush3.bf16.msra.mxu1 %v1895_v18 }
  0x2c   : > { %1744 = vmatprep.subr.bf16.mxu1 %v1896_v23  ;;  %1790 = vmatprep.subr.bf16.mxu0 %v1903_v30 }
  0x2e   : > { %1791 = vmatpush3.bf16.msra.mxu0 %v1903_v30 }
  0x2f   : > { %1745 = vmatpush3.bf16.msra.mxu1 %v1896_v23  ;;  %1792 = vmatprep.subr.bf16.mxu0 %v1904_v31 }
  0x30   : > { %1715 = vmatmul.mubr.msk.bf16.gmra.mxu0 %vm374_vm1, %v1882_v19  ;;  %1746 = vmatprep.subr.bf16.mxu1 %v1897_v24 }
  0x32   : > { %1731 = vmatmul.mubr.msk.bf16.gmra.mxu1 %vm374_vm1, %v1890_v22  ;;  %1793 = vmatpush3.bf16.msra.mxu0 %v1904_v31 }
  0x33   : > { %1747 = vmatpush3.bf16.msra.mxu1 %v1897_v24 }
  0x34   : > { %1748 = vmatprep.subr.bf16.mxu1 %v1898_v25 }
  0x37   : > { %1749 = vmatpush3.bf16.msra.mxu1 %v1898_v25 }
  0xd8   : > { %v1704_v32 = vpop.f32.mrf.mxu0 }
  0xd9   : > { %v470_v38 = vadd.f32 %v1704_v32, %v2269_v34 }
  0xda   : > { %v461_v33 = vpop.f32.mrf.mxu0  ;;  %v2275_v43 = vpop.f32.mrf.mxu1 }
  0xdb   : > { %v462_v36 = vadd.f32 %v2269_v34, %v461_v33  ;;  %v590_v46 = vmax.f32 %v470_v38, 0.0 }
  0xdc   : > { %v1705_v35 = vpop.f32.mrf.mxu0  ;;  %v525_v48 = vpop.f32.mrf.mxu1 }
  0xdd   : > { %v473_v37 = vadd.f32 %v1705_v35, %v2269_v34  ;;  %v588_v44 = vmax.f32 %v462_v36, 0.0  ;;  %v526_v22 = vadd.f32 %v2269_v34, %v525_v48 }
  0xde   : > { %v464_v39 = vpop.f32.mrf.mxu0  ;;  %v2277_v52 = vpop.f32.mrf.mxu1 }
  0xdf   : > { %v465_v40 = vadd.f32 %v2269_v34, %v464_v39  ;;  %v591_v41 = vmax.f32 %v473_v37, 0.0  ;;  %v604_v31 = vmax.f32 %v526_v22, 0.0  ;;  %v2321_v22 = vld [vmem:[%s2834_s4] ss:$0 sm:$0xff] }
  0xe0   : > { %v1708_v42 = vpop.f32.mrf.mxu0  ;;  %v528_v57 = vpop.f32.mrf.mxu1 }
  0xe1   : > { %v589_v45 = vmax.f32 %v465_v40, 0.0  ;;  %v621_v50 = vpack.c.bf16 %v591_v41, %v590_v46  ;;  %v486_v55 = vadd.f32 %v1708_v42, %v2269_v34  ;;  %v529_v23 = vadd.f32 %v2269_v34, %v528_v57 }
  0xe2   : > { %v477_v47 = vpop.f32.mrf.mxu0  ;;  %v2283_v61 = vpop.f32.mrf.mxu1 }
  0xe3   : > { %v620_v49 = vpack.c.bf16 %v589_v45, %v588_v44  ;;  %v478_v53 = vadd.f32 %v2269_v34, %v477_v47  ;;  %v594_v0 = vmax.f32 %v486_v55, 0.0  ;;  %v605_v33 = vmax.f32 %v529_v23, 0.0 }
  0xe4   : > { %v1709_v51 = vpop.f32.mrf.mxu0  ;;  %v541_v2 = vpop.f32.mrf.mxu1  ;;  %v534_v45 = vadd.f32 %v2275_v43, %v2269_v34  ;;  %v537_v47 = vadd.f32 %v2277_v52, %v2269_v34  ;;  %v550_v43 = vadd.f32 %v2283_v61, %v2269_v34 }
  0xe5   : > { %v489_v54 = vadd.f32 %v1709_v51, %v2269_v34  ;;  %1750 = vmatprep.mubr.bf16.mxu1 %v620_v49  ;;  %v592_v62 = vmax.f32 %v478_v53, 0.0  ;;  %v628_v41 = vpack.c.bf16 %v605_v33, %v604_v31  ;;  %v542_v42 = vadd.f32 %v2269_v34, %v541_v2 }
  0xe6   : > { %v480_v56 = vpop.f32.mrf.mxu0  ;;  %1751 = vmatmul.mubr.bf16.vlgmr.msra.gmra.mxu1 %v621_v50  ;;  %v1725_v6 = vpop.f32.mrf.mxu1  ;;  %v606_v51 = vmax.f32 %v534_v45, 0.0  ;;  %v607_v53 = vmax.f32 %v537_v47, 0.0 }
  0xe7   : > { %v481_v58 = vadd.f32 %v2269_v34, %v480_v56  ;;  %v595_v59 = vmax.f32 %v489_v54, 0.0  ;;  %v608_v49 = vmax.f32 %v542_v42, 0.0  ;;  %v553_v52 = vadd.f32 %v1725_v6, %v2269_v34 }
  0xe8   : > { %v1712_v60 = vpop.f32.mrf.mxu0  ;;  %v544_v11 = vpop.f32.mrf.mxu1 }
  0xe9   : > { %v593_v63 = vmax.f32 %v481_v58, 0.0  ;;  %v623_v4 = vpack.c.bf16 %v595_v59, %v594_v0  ;;  %v502_v9 = vadd.f32 %v1712_v60, %v2269_v34  ;;  %v545_v44 = vadd.f32 %v2269_v34, %v544_v11 }
  0xea   : > { %v493_v1 = vpop.f32.mrf.mxu0  ;;  %v1728_v15 = vpop.f32.mrf.mxu1  ;;  %v629_v58 = vpack.c.bf16 %v607_v53, %v606_v51  ;;  %v611_v0 = vmax.f32 %v553_v52, 0.0 }
  0xeb   : > { %v622_v3 = vpack.c.bf16 %v593_v63, %v592_v62  ;;  %v494_v7 = vadd.f32 %v2269_v34, %v493_v1  ;;  %v598_v18 = vmax.f32 %v502_v9, 0.0  ;;  %v609_v50 = vmax.f32 %v545_v44, 0.0 }
  0xec   : > { %v1713_v5 = vpop.f32.mrf.mxu0  ;;  %v557_v20 = vpop.f32.mrf.mxu1  ;;  %v610_v63 = vmax.f32 %v550_v43, 0.0 }
  0xed   : > { %v505_v8 = vadd.f32 %v1713_v5, %v2269_v34  ;;  %1754 = vmatprep.mubr.bf16.mxu1 %v622_v3  ;;  %v596_v16 = vmax.f32 %v494_v7, 0.0  ;;  %v630_v55 = vpack.c.bf16 %v609_v50, %v608_v49  ;;  %v558_v56 = vadd.f32 %v2269_v34, %v557_v20 }
  0xee   : > { %v496_v10 = vpop.f32.mrf.mxu0  ;;  %1755 = vmatmul.mubr.bf16.gmra.mxu1 %v623_v4  ;;  %v1729_v26 = vpop.f32.mrf.mxu1  ;;  %v631_v5 = vpack.c.bf16 %v611_v0, %v610_v63  ;;  %v566_v7 = vadd.f32 %v1728_v15, %v2269_v34  ;;  %v1905_v15 = vld [vmem:[%s2835_s5 + $0x8] sm:$0xff]  }
  0xef   : > { %v497_v12 = vadd.f32 %v2269_v34, %v496_v10  ;;  %v599_v13 = vmax.f32 %v505_v8, 0.0  ;;  %v612_v60 = vmax.f32 %v558_v56, 0.0  ;;  %v569_v61 = vadd.f32 %v1729_v26, %v2269_v34  ;;  %1794 = vmatprep.subr.bf16.mxu0 %v1905_v15 }
  0xf0   : > { %v1716_v14 = vpop.f32.mrf.mxu0  ;;  %v560_v36 = vpop.f32.mrf.mxu1  ;;  %v614_v9 = vmax.f32 %v566_v7, 0.0  ;;  %1795 = vmatpush3.bf16.msra.mxu0 %v1905_v15 }
  0xf1   : > { %v597_v17 = vmax.f32 %v497_v12, 0.0  ;;  %v625_v24 = vpack.c.bf16 %v599_v13, %v598_v18  ;;  %v518_v29 = vadd.f32 %v1716_v14, %v2269_v34  ;;  %v561_v57 = vadd.f32 %v2269_v34, %v560_v36 }
  0xf2   : > { %v509_v19 = vpop.f32.mrf.mxu0  ;;  %v1732_v48 = vpop.f32.mrf.mxu1  ;;  %v615_v10 = vmax.f32 %v569_v61, 0.0 }
  0xf3   : > { %v624_v21 = vpack.c.bf16 %v597_v17, %v596_v16  ;;  %v510_v27 = vadd.f32 %v2269_v34, %v509_v19  ;;  %v602_v39 = vmax.f32 %v518_v29, 0.0  ;;  %v613_v62 = vmax.f32 %v561_v57, 0.0  ;;  %v1906_v19 = vld [vmem:[%s2835_s5] sm:$0xff]  }
  0xf4   : > { %v1717_v25 = vpop.f32.mrf.mxu0  ;;  %v573_v54 = vpop.f32.mrf.mxu1  ;;  %v633_v12 = vpack.c.bf16 %v615_v10, %v614_v9  ;;  %v582_v13 = vadd.f32 %v1732_v48, %v2269_v34  ;;  %1796 = vmatprep.subr.bf16.mxu0 %v1906_v19 }
  0xf5   : > { %v521_v28 = vadd.f32 %v1717_v25, %v2269_v34  ;;  %1758 = vmatprep.mubr.bf16.mxu1 %v624_v21  ;;  %v600_v37 = vmax.f32 %v510_v27, 0.0  ;;  %v632_v2 = vpack.c.bf16 %v613_v62, %v612_v60  ;;  %v574_v3 = vadd.f32 %v2269_v34, %v573_v54  ;;  %1797 = vmatpush3.bf16.msra.mxu0 %v1906_v19 }
  0xf6   : > { %v512_v30 = vpop.f32.mrf.mxu0  ;;  %1759 = vmatmul.mubr.bf16.gmra.mxu1 %v625_v24  ;;  %v1733_v59 = vpop.f32.mrf.mxu1  ;;  %v618_v16 = vmax.f32 %v582_v13, 0.0 }
  0xf7   : > { %v513_v32 = vadd.f32 %v2269_v34, %v512_v30  ;;  %v603_v35 = vmax.f32 %v521_v28, 0.0  ;;  %v616_v6 = vmax.f32 %v574_v3, 0.0  ;;  %v585_v14 = vadd.f32 %v1733_v59, %v2269_v34 }
  0xf8   : > { %v576_v1 = vpop.f32.mrf.mxu1 }
  0xf9   : > { %v601_v38 = vmax.f32 %v513_v32, 0.0  ;;  %v627_v46 = vpack.c.bf16 %v603_v35, %v602_v39  ;;  %v577_v4 = vadd.f32 %v2269_v34, %v576_v1  ;;  %v619_v17 = vmax.f32 %v585_v14, 0.0 }
  0xfb   : > { %v626_v40 = vpack.c.bf16 %v601_v38, %v600_v37  ;;  %v617_v8 = vmax.f32 %v577_v4, 0.0  ;;  %v635_v18 = vpack.c.bf16 %v619_v17, %v618_v16 }
  0xfd   : > { %1762 = vmatprep.mubr.bf16.mxu1 %v626_v40  ;;  %v634_v11 = vpack.c.bf16 %v617_v8, %v616_v6 }
  0xfe   : > { %1763 = vmatmul.mubr.bf16.gmra.mxu1 %v627_v46 }
  0xff   : > { %1766 = vmatprep.mubr.bf16.mxu1 %v628_v41 }
 0x106   : > { %1767 = vmatmul.mubr.bf16.gmra.mxu1 %v629_v58 }
 0x107   : > { %1770 = vmatprep.mubr.bf16.mxu1 %v630_v55 }
 0x10e   : > { %1771 = vmatmul.mubr.bf16.gmra.mxu1 %v631_v5 }
 0x10f   : > { %1774 = vmatprep.mubr.bf16.mxu1 %v632_v2 }
 0x116   : > { %1775 = vmatmul.mubr.bf16.gmra.mxu1 %v633_v12 }
 0x117   : > { %1778 = vmatprep.mubr.bf16.mxu1 %v634_v11 }
 0x11e   : > { %1779 = vmatmul.mubr.bf16.gmra.mxu1 %v635_v18 }
 0x1a6   : > { %v1752_v20 = vpop.f32.mrf.mxu1 }
 0x1a7   : > { %v750_v27 = vadd.f32 %v1752_v20, %v2321_v22 }
 0x1a8   : > { %v741_v34 = vpop.f32.mrf.mxu1 }
 0x1a9   : > { %v742_v25 = vadd.f32 %v2321_v22, %v741_v34 }
 0x1aa   : > { %v1753_v21 = vpop.f32.mrf.mxu1 }
 0x1ab   : > { %v753_v23 = vadd.f32 %v1753_v21, %v2321_v22 }
 0x1ac   : > { %v744_v24 = vpop.f32.mrf.mxu1 }
 0x1ad   : > { %v745_v26 = vadd.f32 %v2321_v22, %v744_v24  ;;  %v869_v30 = vpack.c.bf16 %v753_v23, %v750_v27 }
 0x1ae   : > { %v1756_v28 = vpop.f32.mrf.mxu1 }
 0x1af   : > { %v868_v29 = vpack.c.bf16 %v745_v26, %v742_v25  ;;  %v766_v38 = vadd.f32 %v1756_v28, %v2321_v22 }
 0x1b0   : > { %v757_v31 = vpop.f32.mrf.mxu1 }
 0x1b1   : > { %1798 = vmatprep.mubr.bf16.mxu0 %v868_v29  ;;  %v758_v36 = vadd.f32 %v2321_v22, %v757_v31 }
 0x1b2   : > { %v1757_v32 = vpop.f32.mrf.mxu1  ;;  %1799 = vmatmul.mubr.bf16.vlgmr.msra.gmra.mxu0 %v869_v30 }
 0x1b3   : > { %v769_v33 = vadd.f32 %v1757_v32, %v2321_v22 }
 0x1b4   : > { %v760_v35 = vpop.f32.mrf.mxu1 }
 0x1b5   : > { %v761_v37 = vadd.f32 %v2321_v22, %v760_v35  ;;  %v871_v41 = vpack.c.bf16 %v769_v33, %v766_v38  ;;  %v1109_v38 = vlaneseq }
 0x1b6   : > { %v1760_v39 = vpop.f32.mrf.mxu1 }
 0x1b7   : > { %v870_v40 = vpack.c.bf16 %v761_v37, %v758_v36  ;;  %v782_v49 = vadd.f32 %v1760_v39, %v2321_v22  ;;  %v2355_v39 = vand.u32 127, %v1109_v38 }
 0x1b8   : > { %v773_v42 = vpop.f32.mrf.mxu1 }
 0x1b9   : > { %1802 = vmatprep.mubr.bf16.mxu0 %v870_v40  ;;  %v774_v47 = vadd.f32 %v2321_v22, %v773_v42  ;;  %vm1111_vm2 = vcmp.lt.s32.totalorder %v2355_v39, 2 }
 0x1ba   : > { %v1761_v44 = vpop.f32.mrf.mxu1  ;;  %1803 = vmatmul.mubr.bf16.gmra.mxu0 %v871_v41 }
 0x1bb   : > { %v785_v45 = vadd.f32 %v1761_v44, %v2321_v22 }
 0x1bc   : > { %v776_v46 = vpop.f32.mrf.mxu1 }
 0x1bd   : > { %v777_v48 = vadd.f32 %v2321_v22, %v776_v46  ;;  %v873_v53 = vpack.c.bf16 %v785_v45, %v782_v49 }
 0x1be   : > { %v1764_v50 = vpop.f32.mrf.mxu1 }
 0x1bf   : > { %v872_v51 = vpack.c.bf16 %v777_v48, %v774_v47  ;;  %v798_v52 = vadd.f32 %v1764_v50, %v2321_v22 }
 0x1c0   : > { %v789_v54 = vpop.f32.mrf.mxu1 }
 0x1c1   : > { %1806 = vmatprep.mubr.bf16.mxu0 %v872_v51  ;;  %v790_v58 = vadd.f32 %v2321_v22, %v789_v54 }
 0x1c2   : > { %v1765_v55 = vpop.f32.mrf.mxu1  ;;  %1807 = vmatmul.mubr.bf16.gmra.mxu0 %v873_v53 }
 0x1c3   : > { %v801_v56 = vadd.f32 %v1765_v55, %v2321_v22 }
 0x1c4   : > { %v792_v57 = vpop.f32.mrf.mxu1 }
 0x1c5   : > { %v793_v43 = vadd.f32 %v2321_v22, %v792_v57  ;;  %v875_v62 = vpack.c.bf16 %v801_v56, %v798_v52 }
 0x1c6   : > { %v1768_v59 = vpop.f32.mrf.mxu1 }
 0x1c7   : > { %v874_v60 = vpack.c.bf16 %v793_v43, %v790_v58  ;;  %v814_v5 = vadd.f32 %v1768_v59, %v2321_v22 }
 0x1c8   : > { %v805_v63 = vpop.f32.mrf.mxu1 }
 0x1c9   : > { %1810 = vmatprep.mubr.bf16.mxu0 %v874_v60  ;;  %v806_v3 = vadd.f32 %v2321_v22, %v805_v63 }
 0x1ca   : > { %v1769_v0 = vpop.f32.mrf.mxu1  ;;  %1811 = vmatmul.mubr.bf16.gmra.mxu0 %v875_v62 }
 0x1cb   : > { %v817_v1 = vadd.f32 %v1769_v0, %v2321_v22 }
 0x1cc   : > { %v808_v2 = vpop.f32.mrf.mxu1 }
 0x1cd   : > { %v809_v4 = vadd.f32 %v2321_v22, %v808_v2  ;;  %v877_v6 = vpack.c.bf16 %v817_v1, %v814_v5 }
 0x1ce   : > { %v1772_v7 = vpop.f32.mrf.mxu1 }
 0x1cf   : > { %v876_v61 = vpack.c.bf16 %v809_v4, %v806_v3  ;;  %v830_v14 = vadd.f32 %v1772_v7, %v2321_v22 }
 0x1d0   : > { %v821_v8 = vpop.f32.mrf.mxu1 }
 0x1d1   : > { %1814 = vmatprep.mubr.bf16.mxu0 %v876_v61  ;;  %v822_v12 = vadd.f32 %v2321_v22, %v821_v8 }
 0x1d2   : > { %v1773_v9 = vpop.f32.mrf.mxu1  ;;  %1815 = vmatmul.mubr.bf16.gmra.mxu0 %v877_v6 }
 0x1d3   : > { %v833_v10 = vadd.f32 %v1773_v9, %v2321_v22 }
 0x1d4   : > { %v824_v11 = vpop.f32.mrf.mxu1 }
 0x1d5   : > { %v825_v13 = vadd.f32 %v2321_v22, %v824_v11  ;;  %v879_v18 = vpack.c.bf16 %v833_v10, %v830_v14 }
 0x1d6   : > { %v1776_v16 = vpop.f32.mrf.mxu1 }
 0x1d7   : > { %v878_v17 = vpack.c.bf16 %v825_v13, %v822_v12  ;;  %v846_v24 = vadd.f32 %v1776_v16, %v2321_v22 }
 0x1d8   : > { %v837_v15 = vpop.f32.mrf.mxu1 }
 0x1d9   : > { %1818 = vmatprep.mubr.bf16.mxu0 %v878_v17  ;;  %v838_v21 = vadd.f32 %v2321_v22, %v837_v15 }
 0x1da   : > { %v1777_v19 = vpop.f32.mrf.mxu1  ;;  %1819 = vmatmul.mubr.bf16.gmra.mxu0 %v879_v18 }
 0x1db   : > { %v849_v20 = vadd.f32 %v1777_v19, %v2321_v22 }
 0x1dc   : > { %v840_v34 = vpop.f32.mrf.mxu1 }
 0x1dd   : > { %v841_v23 = vadd.f32 %v2321_v22, %v840_v34  ;;  %v881_v27 = vpack.c.bf16 %v849_v20, %v846_v24 }
 0x1de   : > { %v1780_v25 = vpop.f32.mrf.mxu1 }
 0x1df   : > { %v880_v26 = vpack.c.bf16 %v841_v23, %v838_v21  ;;  %v862_v35 = vadd.f32 %v1780_v25, %v2321_v22 }
 0x1e0   : > { %v853_v28 = vpop.f32.mrf.mxu1 }
 0x1e1   : > { %1822 = vmatprep.mubr.bf16.mxu0 %v880_v26  ;;  %v854_v32 = vadd.f32 %v2321_v22, %v853_v28 }
 0x1e2   : > { %v1781_v29 = vpop.f32.mrf.mxu1  ;;  %1823 = vmatmul.mubr.bf16.gmra.mxu0 %v881_v27 }
 0x1e3   : > { %v865_v30 = vadd.f32 %v1781_v29, %v2321_v22 }
 0x1e4   : > { %v856_v31 = vpop.f32.mrf.mxu1 }
 0x1e5   : > { %v857_v33 = vadd.f32 %v2321_v22, %v856_v31  ;;  %v883_v37 = vpack.c.bf16 %v865_v30, %v862_v35 }
 0x1e7   : > { %v882_v36 = vpack.c.bf16 %v857_v33, %v854_v32 }
 0x1e9   : > { %1826 = vmatprep.mubr.bf16.mxu0 %v882_v36 }
 0x1ea   : > { %1827 = vmatmul.mubr.bf16.gmra.mxu0 %v883_v37 }
 0x272   : > { %v1800_v40 = vpop.f32.mrf.mxu0 }
 0x273   : > { %v2360_v41 = vsel %vm1111_vm2, %v1800_v40, -1e+30 }
 0x274   : > { %1148 = vmax.xlane.f32.xlu1 %v2360_v41  ;;  %v982_v42 = vpop.f32.mrf.mxu0 }
 0x275   : > { %v2365_v22 = vsel %vm1111_vm2, %v982_v42, -1e+30 }
 0x276   : > { %1144 = vmax.xlane.f32.xlu0 %v2365_v22  ;;  %v1801_v44 = vpop.f32.mrf.mxu0 }
 0x277   : > { %v2370_v45 = vsel %vm1111_vm2, %v1801_v44, -1e+30 }
 0x278   : > { %1150 = vmax.xlane.f32.xlu1 %v2370_v45  ;;  %v985_v46 = vpop.f32.mrf.mxu0 }
 0x279   : > { %v2375_v47 = vsel %vm1111_vm2, %v985_v46, -1e+30 }
 0x27a   : > { %1146 = vmax.xlane.f32.xlu0 %v2375_v47  ;;  %v1804_v48 = vpop.f32.mrf.mxu0 }
 0x27b   : > { %v2380_v50 = vsel %vm1111_vm2, %v1804_v48, -1e+30 }
 0x27c   : > { %v998_v49 = vpop.f32.mrf.mxu0 }
 0x27d   : > { %v2390_v55 = vsel %vm1111_vm2, %v998_v49, -1e+30 }
 0x27e   : > { %1156 = vmax.xlane.f32.xlu0 %v2380_v50  ;;  %v1805_v51 = vpop.f32.mrf.mxu0 }
 0x27f   : > { %v2385_v53 = vsel %vm1111_vm2, %v1805_v51, -1e+30 }
 0x280   : > { %1158 = vmax.xlane.f32.xlu1 %v2385_v53  ;;  %v1001_v54 = vpop.f32.mrf.mxu0 }
 0x281   : > { %v2395_v57 = vsel %vm1111_vm2, %v1001_v54, -1e+30 }
 0x282   : > { %1152 = vmax.xlane.f32.xlu0 %v2390_v55  ;;  %v1808_v56 = vpop.f32.mrf.mxu0 }
 0x283   : > { %v2400_v43 = vsel %vm1111_vm2, %v1808_v56, -1e+30 }
 0x284   : > { %1154 = vmax.xlane.f32.xlu1 %v2395_v57  ;;  %v1014_v58 = vpop.f32.mrf.mxu0 }
 0x285   : > { %v2410_v62 = vsel %vm1111_vm2, %v1014_v58, -1e+30 }
 0x286   : > { %1164 = vmax.xlane.f32.xlu0 %v2400_v43  ;;  %v1809_v52 = vpop.f32.mrf.mxu0 }
 0x287   : > { %v2405_v59 = vsel %vm1111_vm2, %v1809_v52, -1e+30 }
 0x288   : > { %1166 = vmax.xlane.f32.xlu1 %v2405_v59  ;;  %v1017_v60 = vpop.f32.mrf.mxu0 }
 0x289   : > { %v2415_v0 = vsel %vm1111_vm2, %v1017_v60, -1e+30 }
 0x28a   : > { %1160 = vmax.xlane.f32.xlu0 %v2410_v62  ;;  %v1812_v63 = vpop.f32.mrf.mxu0 }
 0x28b   : > { %v2420_v2 = vsel %vm1111_vm2, %v1812_v63, -1e+30 }
 0x28c   : > { %1162 = vmax.xlane.f32.xlu1 %v2415_v0  ;;  %v1030_v1 = vpop.f32.mrf.mxu0 }
 0x28d   : > { %v2430_v7 = vsel %vm1111_vm2, %v1030_v1, -1e+30 }
 0x28e   : > { %1172 = vmax.xlane.f32.xlu0 %v2420_v2  ;;  %v1813_v3 = vpop.f32.mrf.mxu0 }
 0x28f   : > { %v2425_v4 = vsel %vm1111_vm2, %v1813_v3, -1e+30 }
 0x290   : > { %1174 = vmax.xlane.f32.xlu1 %v2425_v4  ;;  %v1033_v5 = vpop.f32.mrf.mxu0 }
 0x291   : > { %v2435_v6 = vsel %vm1111_vm2, %v1033_v5, -1e+30 }
 0x292   : > { %1168 = vmax.xlane.f32.xlu0 %v2430_v7  ;;  %v1816_v61 = vpop.f32.mrf.mxu0 }
 0x293   : > { %v2440_v9 = vsel %vm1111_vm2, %v1816_v61, -1e+30 }
 0x294   : > { %1170 = vmax.xlane.f32.xlu1 %v2435_v6  ;;  %v1046_v8 = vpop.f32.mrf.mxu0 }
 0x295   : > { %v2450_v13 = vsel %vm1111_vm2, %v1046_v8, -1e+30 }
 0x296   : > { %1180 = vmax.xlane.f32.xlu0 %v2440_v9  ;;  %v1817_v10 = vpop.f32.mrf.mxu0 }
 0x297   : > { %v2445_v11 = vsel %vm1111_vm2, %v1817_v10, -1e+30 }
 0x298   : > { %1182 = vmax.xlane.f32.xlu1 %v2445_v11  ;;  %v1049_v12 = vpop.f32.mrf.mxu0 }
 0x299   : > { %v2455_v16 = vsel %vm1111_vm2, %v1049_v12, -1e+30 }
 0x29a   : > { %1176 = vmax.xlane.f32.xlu0 %v2450_v13  ;;  %v1820_v14 = vpop.f32.mrf.mxu0 }
 0x29b   : > { %v2460_v18 = vsel %vm1111_vm2, %v1820_v14, -1e+30 }
 0x29c   : > { %1178 = vmax.xlane.f32.xlu1 %v2455_v16  ;;  %v1062_v17 = vpop.f32.mrf.mxu0 }
 0x29d   : > { %v2470_v34 = vsel %vm1111_vm2, %v1062_v17, -1e+30 }
 0x29e   : > { %1188 = vmax.xlane.f32.xlu0 %v2460_v18  ;;  %v1821_v15 = vpop.f32.mrf.mxu0 }
 0x29f   : > { %v2465_v19 = vsel %vm1111_vm2, %v1821_v15, -1e+30 }
 0x2a0   : > { %1190 = vmax.xlane.f32.xlu1 %v2465_v19  ;;  %v1065_v20 = vpop.f32.mrf.mxu0 }
 0x2a1   : > { %v2475_v23 = vsel %vm1111_vm2, %v1065_v20, -1e+30 }
 0x2a2   : > { %1184 = vmax.xlane.f32.xlu0 %v2470_v34  ;;  %v1824_v21 = vpop.f32.mrf.mxu0 }
 0x2a3   : > { %v2480_v25 = vsel %vm1111_vm2, %v1824_v21, -1e+30 }
 0x2a4   : > { %1186 = vmax.xlane.f32.xlu1 %v2475_v23  ;;  %v1078_v24 = vpop.f32.mrf.mxu0 }
 0x2a5   : > { %v2490_v29 = vsel %vm1111_vm2, %v1078_v24, -1e+30 }
 0x2a6   : > { %1196 = vmax.xlane.f32.xlu0 %v2480_v25  ;;  %v1825_v26 = vpop.f32.mrf.mxu0 }
 0x2a7   : > { %v2485_v27 = vsel %vm1111_vm2, %v1825_v26, -1e+30 }
 0x2a8   : > { %1198 = vmax.xlane.f32.xlu1 %v2485_v27  ;;  %v1081_v28 = vpop.f32.mrf.mxu0 }
 0x2a9   : > { %v2495_v31 = vsel %vm1111_vm2, %v1081_v28, -1e+30 }
 0x2aa   : > { %1192 = vmax.xlane.f32.xlu0 %v2490_v29  ;;  %v1828_v30 = vpop.f32.mrf.mxu0 }
 0x2ab   : > { %v2505_v37 = vsel %vm1111_vm2, %v1828_v30, -1e+30 }
 0x2ac   : > { %1194 = vmax.xlane.f32.xlu1 %v2495_v31  ;;  %v1094_v32 = vpop.f32.mrf.mxu0 }
 0x2ad   : > { %v2500_v33 = vsel %vm1111_vm2, %v1094_v32, -1e+30 }
 0x2ae   : > { %1200 = vmax.xlane.f32.xlu0 %v2500_v33  ;;  %v1829_v35 = vpop.f32.mrf.mxu0 }
 0x2af   : > { %v2515_v40 = vsel %vm1111_vm2, %v1829_v35, -1e+30 }
 0x2b0   : > { %v1097_v36 = vpop.f32.mrf.mxu0 }
 0x2b1   : > { %v2509_v38 = vsel %vm1111_vm2, %v1097_v36, -1e+30 }
 0x2b2   : > { %1204 = vmax.xlane.f32.xlu0 %v2505_v37  ;;  %1202 = vmax.xlane.f32.xlu1 %v2509_v38 }
 0x2b6   : > { %1206 = vmax.xlane.f32.xlu1 %v2515_v40 }
 0x2fd   : > { %v1149_v42 = vpop.xlane.xlu1 %1148 }
 0x2fe   : > { %v1210_v44 = vsub.f32 %v2360_v41, %v1149_v42 }
 0x2ff   : > { %v1145_v46 = vpop.xlane.xlu0 %1144 }
 0x300   : > { %v1244_v48 = vmul.f32 1.442695, %v1210_v44  ;;  %v1208_v49 = vsub.f32 %v2365_v22, %v1145_v46 }
 0x301   : > { %v1151_v51 = vpop.xlane.xlu1 %1150 }
 0x302   : > { %1907 = vpow2.f32 %v1244_v48  ;;  %v1240_v54 = vmul.f32 1.442695, %v1208_v49  ;;  %v1211_v56 = vsub.f32 %v2370_v45, %v1151_v51 }
 0x303   : > { %v1147_v58 = vpop.xlane.xlu0 %1146 }
 0x304   : > { %1909 = vpow2.f32 %v1240_v54  ;;  %v1246_v52 = vmul.f32 1.442695, %v1211_v56  ;;  %v1209_v60 = vsub.f32 %v2375_v47, %v1147_v58 }
 0x306   : > { %1911 = vpow2.f32 %v1246_v52  ;;  %v1242_v63 = vmul.f32 1.442695, %v1209_v60 }
 0x307   : > { %v1157_v1 = vpop.xlane.xlu0 %1156 }
 0x308   : > { %1913 = vpow2.f32 %v1242_v63  ;;  %v1214_v41 = vsub.f32 %v2380_v50, %v1157_v1 }
 0x309   : > { %v1159_v3 = vpop.xlane.xlu1 %1158 }
 0x30a   : > { %v1252_v5 = vmul.f32 1.442695, %v1214_v41  ;;  %v1215_v22 = vsub.f32 %v2385_v53, %v1159_v3 }
 0x30b   : > { %v1153_v61 = vpop.xlane.xlu0 %1152 }
 0x30c   : > { %1915 = vpow2.f32 %v1252_v5  ;;  %v1254_v8 = vmul.f32 1.442695, %v1215_v22  ;;  %v1212_v45 = vsub.f32 %v2390_v55, %v1153_v61 }
 0x30d   : > { %v1155_v10 = vpop.xlane.xlu1 %1154 }
 0x30e   : > { %1917 = vpow2.f32 %v1254_v8  ;;  %v1248_v12 = vmul.f32 1.442695, %v1212_v45  ;;  %v1213_v47 = vsub.f32 %v2395_v57, %v1155_v10 }
 0x30f   : > { %v1908_v14 = vpop.eup %1907  ;;  %v1165_v17 = vpop.xlane.xlu0 %1164 }
 0x310   : > { %1919 = vpow2.f32 %v1248_v12  ;;  %v1250_v15 = vmul.f32 1.442695, %v1213_v47  ;;  %v1218_v50 = vsub.f32 %v2400_v43, %v1165_v17  ;;  %v2529_v20 = vsel %vm1111_vm2, %v1908_v14, 0.0 }
 0x311   : > { %v1910_v53 = vpop.eup %1909  ;;  %v1167_v21 = vpop.xlane.xlu1 %1166  ;;  %1340 = vadd.xlane.f32.xlu0 %v2529_v20 }
 0x312   : > { %1921 = vpow2.f32 %v1250_v15  ;;  %v1260_v55 = vmul.f32 1.442695, %v1218_v50  ;;  %v1219_v24 = vsub.f32 %v2405_v59, %v1167_v21  ;;  %v2535_v28 = vsel %vm1111_vm2, %v1910_v53, 0.0 }
 0x313   : > { %v1912_v26 = vpop.eup %1911  ;;  %v1161_v57 = vpop.xlane.xlu0 %1160 }
 0x314   : > { %1923 = vpow2.f32 %v1260_v55  ;;  %v1262_v43 = vmul.f32 1.442695, %v1219_v24  ;;  %v1216_v30 = vsub.f32 %v2410_v62, %v1161_v57  ;;  %v2540_v32 = vsel %vm1111_vm2, %v1912_v26, 0.0 }
 0x315   : > { %v1914_v35 = vpop.eup %1913  ;;  %v1163_v36 = vpop.xlane.xlu1 %1162  ;;  %1336 = vadd.xlane.f32.xlu0 %v2535_v28  ;;  %1342 = vadd.xlane.f32.xlu1 %v2540_v32 }
 0x316   : > { %1925 = vpow2.f32 %v1262_v43  ;;  %v1256_v59 = vmul.f32 1.442695, %v1216_v30  ;;  %v1217_v42 = vsub.f32 %v2415_v0, %v1163_v36  ;;  %v2548_v62 = vsel %vm1111_vm2, %v1914_v35, 0.0 }
 0x317   : > { %v1173_v44 = vpop.xlane.xlu0 %1172 }
 0x318   : > { %1927 = vpow2.f32 %v1256_v59  ;;  %v1258_v46 = vmul.f32 1.442695, %v1217_v42  ;;  %v1222_v48 = vsub.f32 %v2420_v2, %v1173_v44 }
 0x319   : > { %v1916_v49 = vpop.eup %1915  ;;  %v1175_v51 = vpop.xlane.xlu1 %1174  ;;  %1338 = vadd.xlane.f32.xlu1 %v2548_v62 }
 0x31a   : > { %1929 = vpow2.f32 %v1258_v46  ;;  %v1268_v54 = vmul.f32 1.442695, %v1222_v48  ;;  %v1223_v56 = vsub.f32 %v2425_v4, %v1175_v51  ;;  %v2554_v0 = vsel %vm1111_vm2, %v1916_v49, 0.0 }
 0x31b   : > { %v1918_v58 = vpop.eup %1917  ;;  %v1169_v52 = vpop.xlane.xlu0 %1168  ;;  %1348 = vadd.xlane.f32.xlu0 %v2554_v0 }
 0x31c   : > { %1931 = vpow2.f32 %v1268_v54  ;;  %v1270_v2 = vmul.f32 1.442695, %v1223_v56  ;;  %v1220_v60 = vsub.f32 %v2430_v7, %v1169_v52  ;;  %v2560_v63 = vsel %vm1111_vm2, %v1918_v58, 0.0 }
 0x31d   : > { %v1920_v1 = vpop.eup %1919  ;;  %v1171_v41 = vpop.xlane.xlu1 %1170  ;;  %1350 = vadd.xlane.f32.xlu1 %v2560_v63 }
 0x31e   : > { %1933 = vpow2.f32 %v1270_v2  ;;  %v1264_v4 = vmul.f32 1.442695, %v1220_v60  ;;  %v1221_v3 = vsub.f32 %v2435_v6, %v1171_v41  ;;  %v2566_v5 = vsel %vm1111_vm2, %v1920_v1, 0.0 }
 0x31f   : > { %v1922_v22 = vpop.eup %1921  ;;  %v1181_v61 = vpop.xlane.xlu0 %1180  ;;  %1344 = vadd.xlane.f32.xlu0 %v2566_v5 }
 0x320   : > { %1935 = vpow2.f32 %v1264_v4  ;;  %v1266_v7 = vmul.f32 1.442695, %v1221_v3  ;;  %v1226_v8 = vsub.f32 %v2440_v9, %v1181_v61  ;;  %v2572_v45 = vsel %vm1111_vm2, %v1922_v22, 0.0 }
 0x321   : > { %v1924_v10 = vpop.eup %1923  ;;  %v1183_v12 = vpop.xlane.xlu1 %1182  ;;  %1346 = vadd.xlane.f32.xlu1 %v2572_v45 }
 0x322   : > { %1937 = vpow2.f32 %v1266_v7  ;;  %v1276_v6 = vmul.f32 1.442695, %v1226_v8  ;;  %v1227_v47 = vsub.f32 %v2445_v11, %v1183_v12  ;;  %v2578_v14 = vsel %vm1111_vm2, %v1924_v10, 0.0 }
 0x323   : > { %v1926_v17 = vpop.eup %1925  ;;  %v1177_v15 = vpop.xlane.xlu0 %1176  ;;  %1356 = vadd.xlane.f32.xlu0 %v2578_v14 }
 0x324   : > { %1939 = vpow2.f32 %v1276_v6  ;;  %v1278_v9 = vmul.f32 1.442695, %v1227_v47  ;;  %v1224_v50 = vsub.f32 %v2450_v13, %v1177_v15  ;;  %v2584_v53 = vsel %vm1111_vm2, %v1926_v17, 0.0 }
 0x325   : > { %v1928_v21 = vpop.eup %1927  ;;  %v1179_v55 = vpop.xlane.xlu1 %1178  ;;  %1358 = vadd.xlane.f32.xlu1 %v2584_v53 }
 0x326   : > { %1941 = vpow2.f32 %v1278_v9  ;;  %v1272_v11 = vmul.f32 1.442695, %v1224_v50  ;;  %v1225_v24 = vsub.f32 %v2455_v16, %v1179_v55  ;;  %v2590_v26 = vsel %vm1111_vm2, %v1928_v21, 0.0 }
 0x327   : > { %v1930_v57 = vpop.eup %1929  ;;  %v1189_v43 = vpop.xlane.xlu0 %1188  ;;  %1352 = vadd.xlane.f32.xlu0 %v2590_v26 }
 0x328   : > { %1943 = vpow2.f32 %v1272_v11  ;;  %v1274_v13 = vmul.f32 1.442695, %v1225_v24  ;;  %v1230_v30 = vsub.f32 %v2460_v18, %v1189_v43  ;;  %v2596_v35 = vsel %vm1111_vm2, %v1930_v57, 0.0 }
 0x329   : > { %v1932_v36 = vpop.eup %1931  ;;  %v1191_v59 = vpop.xlane.xlu1 %1190  ;;  %1354 = vadd.xlane.f32.xlu1 %v2596_v35 }
 0x32a   : > { %1945 = vpow2.f32 %v1274_v13  ;;  %v1284_v16 = vmul.f32 1.442695, %v1230_v30  ;;  %v1231_v42 = vsub.f32 %v2465_v19, %v1191_v59  ;;  %v2602_v44 = vsel %vm1111_vm2, %v1932_v36, 0.0 }
 0x32b   : > { %v1934_v46 = vpop.eup %1933  ;;  %v1185_v48 = vpop.xlane.xlu0 %1184  ;;  %1364 = vadd.xlane.f32.xlu0 %v2602_v44 }
 0x32c   : > { %1947 = vpow2.f32 %v1284_v16  ;;  %v1286_v18 = vmul.f32 1.442695, %v1231_v42  ;;  %v1228_v49 = vsub.f32 %v2470_v34, %v1185_v48  ;;  %v2608_v51 = vsel %vm1111_vm2, %v1934_v46, 0.0 }
 0x32d   : > { %v1936_v54 = vpop.eup %1935  ;;  %v1187_v56 = vpop.xlane.xlu1 %1186  ;;  %1366 = vadd.xlane.f32.xlu1 %v2608_v51 }
 0x32e   : > { %1949 = vpow2.f32 %v1286_v18  ;;  %v1280_v19 = vmul.f32 1.442695, %v1228_v49  ;;  %v1229_v58 = vsub.f32 %v2475_v23, %v1187_v56  ;;  %v2614_v52 = vsel %vm1111_vm2, %v1936_v54, 0.0 }
 0x32f   : > { %v1938_v2 = vpop.eup %1937  ;;  %v1197_v60 = vpop.xlane.xlu0 %1196  ;;  %1360 = vadd.xlane.f32.xlu0 %v2614_v52 }
 0x330   : > { %1951 = vpow2.f32 %v1280_v19  ;;  %v1282_v34 = vmul.f32 1.442695, %v1229_v58  ;;  %v1234_v1 = vsub.f32 %v2480_v25, %v1197_v60  ;;  %v2620_v41 = vsel %vm1111_vm2, %v1938_v2, 0.0 }
 0x331   : > { %v1940_v4 = vpop.eup %1939  ;;  %v1199_v3 = vpop.xlane.xlu1 %1198  ;;  %1362 = vadd.xlane.f32.xlu1 %v2620_v41 }
 0x332   : > { %1953 = vpow2.f32 %v1282_v34  ;;  %v1292_v23 = vmul.f32 1.442695, %v1234_v1  ;;  %v1235_v22 = vsub.f32 %v2485_v27, %v1199_v3  ;;  %v2626_v61 = vsel %vm1111_vm2, %v1940_v4, 0.0 }
 0x333   : > { %v1942_v7 = vpop.eup %1941  ;;  %v1193_v8 = vpop.xlane.xlu0 %1192  ;;  %1372 = vadd.xlane.f32.xlu0 %v2626_v61 }
 0x334   : > { %1955 = vpow2.f32 %v1292_v23  ;;  %v1294_v25 = vmul.f32 1.442695, %v1235_v22  ;;  %v1232_v10 = vsub.f32 %v2490_v29, %v1193_v8  ;;  %v2632_v12 = vsel %vm1111_vm2, %v1942_v7, 0.0 }
 0x335   : > { %v1944_v6 = vpop.eup %1943  ;;  %v1195_v47 = vpop.xlane.xlu1 %1194  ;;  %1374 = vadd.xlane.f32.xlu1 %v2632_v12 }
 0x336   : > { %1957 = vpow2.f32 %v1294_v25  ;;  %v1288_v27 = vmul.f32 1.442695, %v1232_v10  ;;  %v1233_v17 = vsub.f32 %v2495_v31, %v1195_v47  ;;  %v2638_v15 = vsel %vm1111_vm2, %v1944_v6, 0.0 }
 0x337   : > { %v1946_v9 = vpop.eup %1945  ;;  %1368 = vadd.xlane.f32.xlu0 %v2638_v15  ;;  %v1201_v29 = vpop.xlane.xlu0 %1200 }
 0x338   : > { %1959 = vpow2.f32 %v1288_v27  ;;  %v1290_v50 = vmul.f32 1.442695, %v1233_v17  ;;  %v1236_v21 = vsub.f32 %v2500_v33, %v1201_v29  ;;  %v2644_v55 = vsel %vm1111_vm2, %v1946_v9, 0.0 }
 0x339   : > { %v1948_v11 = vpop.eup %1947  ;;  %1370 = vadd.xlane.f32.xlu1 %v2644_v55 }
 0x33a   : > { %1961 = vpow2.f32 %v1290_v50  ;;  %v1296_v31 = vmul.f32 1.442695, %v1236_v21  ;;  %v2649_v24 = vsel %vm1111_vm2, %v1948_v11, 0.0 }
 0x33b   : > { %v1950_v57 = vpop.eup %1949  ;;  %1380 = vadd.xlane.f32.xlu0 %v2649_v24  ;;  %v1205_v43 = vpop.xlane.xlu0 %1204 }
 0x33c   : > { %v1203_v13 = vpop.xlane.xlu1 %1202  ;;  %1963 = vpow2.f32 %v1296_v31  ;;  %v1238_v33 = vsub.f32 %v2505_v37, %v1205_v43  ;;  %v2656_v36 = vsel %vm1111_vm2, %v1950_v57, 0.0 }
 0x33d   : > { %v1237_v30 = vsub.f32 %v2509_v38, %v1203_v13  ;;  %v1952_v59 = vpop.eup %1951  ;;  %1382 = vadd.xlane.f32.xlu1 %v2656_v36 }
 0x33e   : > { %v1300_v16 = vmul.f32 1.442695, %v1238_v33  ;;  %v2661_v46 = vsel %vm1111_vm2, %v1952_v59, 0.0 }
 0x33f   : > { %v1298_v42 = vmul.f32 1.442695, %v1237_v30  ;;  %v1954_v48 = vpop.eup %1953  ;;  %1376 = vadd.xlane.f32.xlu0 %v2661_v46 }
 0x340   : > { %v1207_v18 = vpop.xlane.xlu1 %1206  ;;  %1965 = vpow2.f32 %v1300_v16  ;;  %v2667_v38 = vsel %vm1111_vm2, %v1954_v48, 0.0 }
 0x341   : > { %v1239_v37 = vsub.f32 %v2515_v40, %v1207_v18  ;;  %v1956_v49 = vpop.eup %1955  ;;  %1967 = vpow2.f32 %v1298_v42  ;;  %1378 = vadd.xlane.f32.xlu1 %v2667_v38 }
 0x342   : > { %v2672_v56 = vsel %vm1111_vm2, %v1956_v49, 0.0 }
 0x343   : > { %v1302_v54 = vmul.f32 1.442695, %v1239_v37  ;;  %v1958_v19 = vpop.eup %1957  ;;  %1388 = vadd.xlane.f32.xlu0 %v2672_v56 }
 0x344   : > { %v2677_v40 = vsel %vm1111_vm2, %v1958_v19, 0.0 }
 0x345   : > { %1969 = vpow2.f32 %v1302_v54  ;;  %v1960_v58 = vpop.eup %1959  ;;  %1390 = vadd.xlane.f32.xlu1 %v2677_v40 }
 0x346   : > { %v2682_v2 = vsel %vm1111_vm2, %v1960_v58, 0.0 }
 0x347   : > { %v1962_v60 = vpop.eup %1961  ;;  %1384 = vadd.xlane.f32.xlu0 %v2682_v2 }
 0x348   : > { %v2687_v34 = vsel %vm1111_vm2, %v1962_v60, 0.0 }
 0x349   : > { %v1964_v1 = vpop.eup %1963  ;;  %1386 = vadd.xlane.f32.xlu1 %v2687_v34 }
 0x34a   : > { %v2692_v4 = vsel %vm1111_vm2, %v1964_v1, 0.0 }
 0x34b   : > { %1392 = vadd.xlane.f32.xlu0 %v2692_v4 }
 0x34d   : > { %v1966_v3 = vpop.eup %1965 }
 0x34e   : > { %v1968_v23 = vpop.eup %1967  ;;  %v2697_v22 = vsel %vm1111_vm2, %v1966_v3, 0.0 }
 0x34f   : > { %1396 = vadd.xlane.f32.xlu0 %v2697_v22  ;;  %v2702_v7 = vsel %vm1111_vm2, %v1968_v23, 0.0 }
 0x350   : > { %1394 = vadd.xlane.f32.xlu1 %v2702_v7 }
 0x352   : > { %v1970_v8 = vpop.eup %1969 }
 0x353   : > { %v2707_v25 = vsel %vm1111_vm2, %v1970_v8, 0.0 }
 0x354   : > { %1398 = vadd.xlane.f32.xlu1 %v2707_v25 }
 0x39a   : > { %v1341_v10 = vpop.xlane.xlu0 %1340 }
 0x39b   : > { %1971 = vrcp.f32 %v1341_v10 }
 0x39e   : > { %v1337_v6 = vpop.xlane.xlu0 %1336  ;;  %v1343_v47 = vpop.xlane.xlu1 %1342 }
 0x39f   : > { %1973 = vrcp.f32 %v1337_v6 }
 0x3a0   : > { %1975 = vrcp.f32 %v1343_v47 }
 0x3a2   : > { %v1339_v27 = vpop.xlane.xlu1 %1338 }
 0x3a3   : > { %1977 = vrcp.f32 %v1339_v27 }
 0x3a4   : > { %v1349_v17 = vpop.xlane.xlu0 %1348 }
 0x3a5   : > { %1979 = vrcp.f32 %v1349_v17 }
 0x3a6   : > { %v1351_v9 = vpop.xlane.xlu1 %1350 }
 0x3a7   : > { %1981 = vrcp.f32 %v1351_v9 }
 0x3a8   : > { %v1972_v39 = vpop.eup %1971  ;;  %v1345_v29 = vpop.xlane.xlu0 %1344 }
 0x3a9   : > { %v1434_v50 = vmul.f32 %v1972_v39, %v2529_v20  ;;  %1983 = vrcp.f32 %v1345_v29 }
 0x3aa   : > { %v1347_v21 = vpop.xlane.xlu1 %1346 }
 0x3ab   : > { %1466 = vst [vmem:[%s2714_s9 + $0x10] sm:$0xff] %v1434_v50  ;;  %1985 = vrcp.f32 %v1347_v21 }
 0x3ac   : > { %v1974_v11 = vpop.eup %1973  ;;  %v1357_v31 = vpop.xlane.xlu0 %1356 }
 0x3ad   : > { %v1976_v57 = vpop.eup %1975  ;;  %v1432_v43 = vmul.f32 %v1974_v11, %v2535_v28  ;;  %1987 = vrcp.f32 %v1357_v31 }
 0x3ae   : > { %v1435_v13 = vmul.f32 %v1976_v57, %v2540_v32  ;;  %v1359_v20 = vpop.xlane.xlu1 %1358 }
 0x3af   : > { %1464 = vst [vmem:[%s2714_s9] sm:$0xff] %v1432_v43  ;;  %1989 = vrcp.f32 %v1359_v20 }
 0x3b0   : > { %v1978_v33 = vpop.eup %1977  ;;  %1467 = vst [vmem:[%s2714_s9 + $0x18] sm:$0xff] %v1435_v13  ;;  %v1353_v30 = vpop.xlane.xlu0 %1352 }
 0x3b1   : > { %v1433_v59 = vmul.f32 %v1978_v33, %v2548_v62  ;;  %1991 = vrcp.f32 %v1353_v30 }
 0x3b2   : > { %v1980_v16 = vpop.eup %1979  ;;  %v1355_v42 = vpop.xlane.xlu1 %1354 }
 0x3b3   : > { %1465 = vst [vmem:[%s2714_s9 + $0x8] sm:$0xff] %v1433_v59  ;;  %v1438_v28 = vmul.f32 %v1980_v16, %v2554_v0  ;;  %1993 = vrcp.f32 %v1355_v42 }
 0x3b4   : > { %v1982_v48 = vpop.eup %1981  ;;  %v1365_v32 = vpop.xlane.xlu0 %1364 }
 0x3b5   : > { %1470 = vst [vmem:[%s2714_s9 + $0x30] sm:$0xff] %v1438_v28  ;;  %v1439_v18 = vmul.f32 %v1982_v48, %v2560_v63  ;;  %1995 = vrcp.f32 %v1365_v32 }
 0x3b6   : > { %v1984_v37 = vpop.eup %1983  ;;  %v1367_v49 = vpop.xlane.xlu1 %1366 }
 0x3b7   : > { %1471 = vst [vmem:[%s2714_s9 + $0x38] sm:$0xff] %v1439_v18  ;;  %v1436_v62 = vmul.f32 %v1984_v37, %v2566_v5  ;;  %1997 = vrcp.f32 %v1367_v49 }
 0x3b8   : > { %v1986_v54 = vpop.eup %1985  ;;  %v1361_v19 = vpop.xlane.xlu0 %1360 }
 0x3b9   : > { %1468 = vst [vmem:[%s2714_s9 + $0x20] sm:$0xff] %v1436_v62  ;;  %v1437_v0 = vmul.f32 %v1986_v54, %v2572_v45  ;;  %1999 = vrcp.f32 %v1361_v19 }
 0x3ba   : > { %v1988_v58 = vpop.eup %1987  ;;  %v1363_v60 = vpop.xlane.xlu1 %1362 }
 0x3bb   : > { %1469 = vst [vmem:[%s2714_s9 + $0x28] sm:$0xff] %v1437_v0  ;;  %v1442_v63 = vmul.f32 %v1988_v58, %v2578_v14  ;;  %2001 = vrcp.f32 %v1363_v60 }
 0x3bc   : > { %v1990_v1 = vpop.eup %1989  ;;  %v1373_v3 = vpop.xlane.xlu0 %1372 }
 0x3bd   : > { %1474 = vst [vmem:[%s2714_s9 + $0x50] sm:$0xff] %v1442_v63  ;;  %v1443_v5 = vmul.f32 %v1990_v1, %v2584_v53  ;;  %2003 = vrcp.f32 %v1373_v3 }
 0x3be   : > { %v1992_v23 = vpop.eup %1991  ;;  %v1375_v8 = vpop.xlane.xlu1 %1374 }
 0x3bf   : > { %1475 = vst [vmem:[%s2714_s9 + $0x58] sm:$0xff] %v1443_v5  ;;  %v1440_v45 = vmul.f32 %v1992_v23, %v2590_v26  ;;  %2005 = vrcp.f32 %v1375_v8 }
 0x3c0   : > { %v1994_v10 = vpop.eup %1993  ;;  %v1369_v6 = vpop.xlane.xlu0 %1368 }
 0x3c1   : > { %1472 = vst [vmem:[%s2714_s9 + $0x40] sm:$0xff] %v1440_v45  ;;  %v1441_v14 = vmul.f32 %v1994_v10, %v2596_v35  ;;  %2007 = vrcp.f32 %v1369_v6 }
 0x3c2   : > { %v1996_v47 = vpop.eup %1995  ;;  %v1371_v27 = vpop.xlane.xlu1 %1370 }
 0x3c3   : > { %1473 = vst [vmem:[%s2714_s9 + $0x48] sm:$0xff] %v1441_v14  ;;  %v1446_v53 = vmul.f32 %v1996_v47, %v2602_v44  ;;  %2009 = vrcp.f32 %v1371_v27 }
 0x3c4   : > { %v1998_v17 = vpop.eup %1997  ;;  %v1381_v9 = vpop.xlane.xlu0 %1380 }
 0x3c5   : > { %1478 = vst [vmem:[%s2714_s9 + $0x70] sm:$0xff] %v1446_v53  ;;  %v1447_v26 = vmul.f32 %v1998_v17, %v2608_v51  ;;  %2011 = vrcp.f32 %v1381_v9 }
 0x3c6   : > { %v2000_v39 = vpop.eup %1999  ;;  %v1383_v29 = vpop.xlane.xlu1 %1382 }
 0x3c7   : > { %1479 = vst [vmem:[%s2714_s9 + $0x78] sm:$0xff] %v1447_v26  ;;  %v1444_v35 = vmul.f32 %v2000_v39, %v2614_v52  ;;  %2013 = vrcp.f32 %v1383_v29 }
 0x3c8   : > { %v2002_v50 = vpop.eup %2001  ;;  %v1377_v21 = vpop.xlane.xlu0 %1376 }
 0x3c9   : > { %1476 = vst [vmem:[%s2714_s9 + $0x60] sm:$0xff] %v1444_v35  ;;  %v1445_v44 = vmul.f32 %v2002_v50, %v2620_v41  ;;  %2015 = vrcp.f32 %v1377_v21 }
 0x3ca   : > { %v2004_v11 = vpop.eup %2003  ;;  %v1379_v31 = vpop.xlane.xlu1 %1378 }
 0x3cb   : > { %1477 = vst [vmem:[%s2714_s9 + $0x68] sm:$0xff] %v1445_v44  ;;  %v1450_v51 = vmul.f32 %v2004_v11, %v2626_v61  ;;  %2017 = vrcp.f32 %v1379_v31 }
 0x3cc   : > { %v2006_v57 = vpop.eup %2005  ;;  %v1389_v43 = vpop.xlane.xlu0 %1388 }
 0x3cd   : > { %1482 = vst [vmem:[%s2714_s9 + $0x90] sm:$0xff] %v1450_v51  ;;  %v1451_v52 = vmul.f32 %v2006_v57, %v2632_v12  ;;  %2019 = vrcp.f32 %v1389_v43 }
 0x3ce   : > { %v2008_v13 = vpop.eup %2007  ;;  %v1391_v20 = vpop.xlane.xlu1 %1390 }
 0x3cf   : > { %1483 = vst [vmem:[%s2714_s9 + $0x98] sm:$0xff] %v1451_v52  ;;  %v1448_v41 = vmul.f32 %v2008_v13, %v2638_v15  ;;  %2021 = vrcp.f32 %v1391_v20 }
 0x3d0   : > { %v2010_v33 = vpop.eup %2009  ;;  %v1385_v30 = vpop.xlane.xlu0 %1384 }
 0x3d1   : > { %1480 = vst [vmem:[%s2714_s9 + $0x80] sm:$0xff] %v1448_v41  ;;  %v1449_v61 = vmul.f32 %v2010_v33, %v2644_v55  ;;  %2023 = vrcp.f32 %v1385_v30 }
 0x3d2   : > { %v2012_v59 = vpop.eup %2011  ;;  %v1387_v16 = vpop.xlane.xlu1 %1386 }
 0x3d3   : > { %1481 = vst [vmem:[%s2714_s9 + $0x88] sm:$0xff] %v1449_v61  ;;  %v1454_v12 = vmul.f32 %v2012_v59, %v2649_v24  ;;  %2025 = vrcp.f32 %v1387_v16 }
 0x3d4   : > { %v2014_v42 = vpop.eup %2013  ;;  %v1393_v28 = vpop.xlane.xlu0 %1392 }
 0x3d5   : > { %1486 = vst [vmem:[%s2714_s9 + $0xb0] sm:$0xff] %v1454_v12  ;;  %v1455_v15 = vmul.f32 %v2014_v42, %v2656_v36  ;;  %2027 = vrcp.f32 %v1393_v28 }
 0x3d6   : > { %v2016_v48 = vpop.eup %2015 }
 0x3d7   : > { %1487 = vst [vmem:[%s2714_s9 + $0xb8] sm:$0xff] %v1455_v15  ;;  %v1452_v55 = vmul.f32 %v2016_v48, %v2661_v46 }
 0x3d8   : > { %v2018_v32 = vpop.eup %2017  ;;  %v1397_v18 = vpop.xlane.xlu0 %1396 }
 0x3d9   : > { %1484 = vst [vmem:[%s2714_s9 + $0xa0] sm:$0xff] %v1452_v55  ;;  %v1453_v37 = vmul.f32 %v2018_v32, %v2667_v38  ;;  %2029 = vrcp.f32 %v1397_v18  ;;  %v1395_v24 = vpop.xlane.xlu1 %1394 }
 0x3da   : > { %v2020_v49 = vpop.eup %2019  ;;  %2031 = vrcp.f32 %v1395_v24 }
 0x3db   : > { %1485 = vst [vmem:[%s2714_s9 + $0xa8] sm:$0xff] %v1453_v37  ;;  %v1458_v36 = vmul.f32 %v2020_v49, %v2672_v56 }
 0x3dc   : > { %v2022_v62 = vpop.eup %2021 }
 0x3dd   : > { %1490 = vst [vmem:[%s2714_s9 + $0xd0] sm:$0xff] %v1458_v36  ;;  %v1459_v46 = vmul.f32 %v2022_v62, %v2677_v40  ;;  %v1399_v54 = vpop.xlane.xlu1 %1398 }
 0x3de   : > { %v2024_v19 = vpop.eup %2023  ;;  %2033 = vrcp.f32 %v1399_v54 }
 0x3df   : > { %1491 = vst [vmem:[%s2714_s9 + $0xd8] sm:$0xff] %v1459_v46  ;;  %v1456_v38 = vmul.f32 %v2024_v19, %v2682_v2 }
 0x3e0   : > { %v2026_v0 = vpop.eup %2025 }
 0x3e1   : > { %1488 = vst [vmem:[%s2714_s9 + $0xc0] sm:$0xff] %v1456_v38  ;;  %v1457_v58 = vmul.f32 %v2026_v0, %v2687_v34 }
 0x3e2   : > { %v2028_v60 = vpop.eup %2027 }
 0x3e3   : > { %1489 = vst [vmem:[%s2714_s9 + $0xc8] sm:$0xff] %v1457_v58  ;;  %v1460_v56 = vmul.f32 %v2028_v60, %v2692_v4 }
 0x3e5   : > { %1492 = vst [vmem:[%s2714_s9 + $0xe0] sm:$0xff] %v1460_v56 }
 0x3e6   : > { %v2030_v40 = vpop.eup %2029 }
 0x3e7   : > { %v2032_v63 = vpop.eup %2031  ;;  %v1462_v1 = vmul.f32 %v2030_v40, %v2697_v22 }
 0x3e8   : > { %v1461_v3 = vmul.f32 %v2032_v63, %v2702_v7 }
 0x3e9   : > { %1494 = vst [vmem:[%s2714_s9 + $0xf0] sm:$0xff] %v1462_v1 }
 0x3ea   : > { %1493 = vst [vmem:[%s2714_s9 + $0xe8] sm:$0xff] %v1461_v3 }
 0x3eb   : > { %v2034_v2 = vpop.eup %2033 }
 0x3ec   : > { %v1463_v34 = vmul.f32 %v2034_v2, %v2707_v25 }
 0x3ee   : > { %1495 = vst [vmem:[%s2714_s9 + $0xf8] sm:$0xff] %v1463_v34 }
 0x3ef   : > { %2048 = shalt.err (!%p2045_p3)
}
 0x3f0   : > { %s2049_s19 = scalar_lea.hbm %s2782_s14, 4096  ;;  %s2053_s28 = scalar_lea.hbm %s2836_s6, 16384 }
 0x3f1   : > { %p2050_p4 = scmp.ne.s32.totalorder %s2782_s14, %s2049_s19  ;;  %p2054_p9 = scmp.lt.s32.totalorder %s2782_s14, %s2836_s6 }
 0x3f2   : > { %p2055_p10 = scmp.lt.s32.totalorder %s2053_s28, %s2049_s19 }
 0x3f3   : > { %p2051_p7 = pnand %p2050_p4, %p2173_p5 }
 0x3f4   : > { %p2056_p11 = por %p2055_p10, %p2054_p9 }
 0x3f5   : > { %p2052_p8 = pneg %p2051_p7 }
 0x3f7   : > { %p2057_p12 = pnand %p2056_p11, %p2052_p8 }
 0x3f9   : > { %2060 = shalt.err (!%p2057_p12)
}
 0x3fa   : > { %s2098_s10 = smov 128   ;;  %s2099_s12 = smov 8  }
 0x3fb   : > { %1834 = dma.vmem_to_hbm [thread:$0]  (%p2173_p5), %s2784_s11, 4096, %s2782_s14, %s2790_s15, %s2098_s10, %s2098_s10, %s2099_s12  }
 0x3fc PF: > { %p1840_p13 = scmp.ge.s32.totalorder %s2095_s24, 2  ;;  %s1525_s13 = sand.u32 1, %s2083_s21  }
 0x3fd   : > { %s1526_s25 = scalar_lea.sflag [#allocation3], %s1525_s13 }
 0x3fe   : > { %p1837_p0 = pnand %p1840_p13, %p2177_p6 }
 0x400   : > { %p1838_p1 = pneg %p1837_p0 }
 0x402   : > { %2078 = dma.done.wait (%p1838_p1), %s1526_s25, 4096  }
 0x403   : > { %2080 = vsyncadd (%p1838_p1), %s1526_s25, 4294963200  ;;  %p16_p2 = scmp.ge.s32.totalorder %s2160_s27, 6   ;;  %s2839_s21 = smov %s2087_s22 }
 0x404   : > { %s2840_s22 = smov %s2091_s23  ;;  %s2841_s23 = smov %s2171_s30 }
 0x405   : > { %s2842_s24 = smov %s2160_s27  ;;  %18 = sbr.rel (!%p16_p2) target bundleno = 3 (0x3), region = 79 }
 0x40a   :  { %1531 = vsyncpa [#allocation3], 1 }
 0x40b   :  { %1533 = vsyncpa [#allocation3 + $0x1], 1 }

</bundles_post_ra>
